<compile_context>
chip_gen: v7x
topology: tpu7x:2x2x1
jax: 0.10.0
libtpu: 0.0.40
codegen_flags: <defaults>
</compile_context>

<pallas_src>
import functools

import jax
import jax.numpy as jnp
from jax.experimental import pallas as pl
from jax.experimental.pallas import tpu as pltpu


def _round_up(x, m):
    return ((x + m - 1) // m) * m


def _qnet_kernel(x_ref, w1_ref, b1_ref, w2_ref, b2_ref, w3_ref, b3_ref, o_ref):
    # Activation cast happens in-kernel (VPU op hidden under MXU slack) so the
    # wrapper never materializes a casted copy of the batch in HBM.
    x = x_ref[...].astype(w1_ref.dtype)                               # (bm, S)
    h1 = jnp.dot(x, w1_ref[...], preferred_element_type=jnp.float32)
    h1 = jnp.maximum(h1 + b1_ref[...], 0.0)                           # (bm, 128) f32
    h2 = jnp.dot(h1.astype(w2_ref.dtype), w2_ref[...],
                 preferred_element_type=jnp.float32)
    h2 = jnp.maximum(h2 + b2_ref[...], 0.0)                           # (bm, 128) f32
    q = jnp.dot(h2.astype(w3_ref.dtype), w3_ref[...],
                preferred_element_type=jnp.float32)
    o_ref[...] = (q + b3_ref[...]).astype(o_ref.dtype)                # (bm, 128)


@functools.partial(jax.jit,
                   static_argnames=("action_size", "block_m", "out_dtype"))
def qnetwork_forward(state, params, *, action_size, block_m=512,
                     out_dtype=jnp.float32):
    """state: (B, state_size) f32 -> q_values: (B, action_size) out_dtype.

    Matmul operand dtype is taken from params["w1"].dtype (bf16 by default via
    init_qnetwork_params); accumulation / bias-add / ReLU are always f32.
    """
    w1, b1, w2, b2, w3, b3 = (
        params["w1"], params["b1"], params["w2"], params["b2"],
        params["w3"], params["b3"],
    )
    B, S = state.shape
    Hp = w1.shape[1]    # padded hidden (128)
    Ap = w3.shape[1]    # padded action dim (128)

    # Batch tile: as large as block_m allows, but split so that there are at
    # least two grid steps when the batch is big enough (v7x megacore), and
    # never larger than the sublane-rounded batch (tiny batches = 1 step).
    half = max(8, _round_up((B + 1) // 2, 8))
    bm = max(8, min(block_m, half))
    n_blocks = (B + bm - 1) // bm
    B_pad = n_blocks * bm
    if B_pad != B:
        state = jnp.pad(state, ((0, B_pad - B), (0, 0)))

    q_pad = pl.pallas_call(
        _qnet_kernel,
        out_shape=jax.ShapeDtypeStruct((B_pad, Ap), out_dtype),
        grid_spec=pltpu.PrefetchScalarGridSpec(
            num_scalar_prefetch=0,
            grid=(n_blocks,),
            in_specs=[
                pl.BlockSpec((bm, S), lambda i: (i, 0)),    # x tile
                pl.BlockSpec((S, Hp), lambda i: (0, 0)),    # w1 (resident)
                pl.BlockSpec((1, Hp), lambda i: (0, 0)),    # b1 (f32)
                pl.BlockSpec((Hp, Hp), lambda i: (0, 0)),   # w2
                pl.BlockSpec((1, Hp), lambda i: (0, 0)),    # b2
                pl.BlockSpec((Hp, Ap), lambda i: (0, 0)),   # w3
                pl.BlockSpec((1, Ap), lambda i: (0, 0)),    # b3
            ],
            out_specs=pl.BlockSpec((bm, Ap), lambda i: (i, 0)),  # lane-dense
        ),
        compiler_params=pltpu.CompilerParams(
            dimension_semantics=("parallel",)),
    )(state, w1, b1, w2, b2, w3, b3)

    return q_pad[:B, :action_size]


def init_qnetwork_params(key, state_size, action_size, hidden=64,
                         weight_dtype=jnp.bfloat16):
    """nn.Linear-style U(-1/sqrt(fan_in)) init, stored transposed (in, out),
    zero-padded so hidden/output feature dims are lane-dense (128).  Weights
    are stored directly in the matmul dtype (bf16 by default) so no per-call
    cast is needed; biases stay f32 (f32 bias-add / accumulation)."""
    keys = jax.random.split(key, 6)
    Hp = _round_up(max(hidden, 128), 128)
    Ap = _round_up(max(action_size, 128), 128)

    def linear(kw, kb, fan_in, fan_out, rows, cols):
        bound = float(fan_in) ** -0.5
        w = jax.random.uniform(kw, (fan_in, fan_out), jnp.float32, -bound, bound)
        b = jax.random.uniform(kb, (1, fan_out), jnp.float32, -bound, bound)
        w_pad = jnp.zeros((rows, cols), jnp.float32).at[:fan_in, :fan_out].set(w)
        b_pad = jnp.zeros((1, cols), jnp.float32).at[:, :fan_out].set(b)
        return w_pad.astype(weight_dtype), b_pad

    w1, b1 = linear(keys[0], keys[1], state_size, hidden, state_size, Hp)
    w2, b2 = linear(keys[2], keys[3], hidden, hidden, Hp, Hp)
    w3, b3 = linear(keys[4], keys[5], hidden, action_size, Hp, Ap)
    return {"w1": w1, "b1": b1, "w2": w2, "b2": b2, "w3": w3, "b3": b3}


def qnetwork_reference(state, params, action_size):
    """Pure-JAX reference matching the kernel's mixed-precision recipe."""
    x = state.astype(params["w1"].dtype)
    h1 = jnp.maximum(
        jnp.dot(x, params["w1"], preferred_element_type=jnp.float32)
        + params["b1"], 0.0)
    h2 = jnp.maximum(
        jnp.dot(h1.astype(params["w2"].dtype), params["w2"],
                preferred_element_type=jnp.float32) + params["b2"], 0.0)
    q = jnp.dot(h2.astype(params["w3"].dtype), params["w3"],
                preferred_element_type=jnp.float32) + params["b3"]
    return q[:, :action_size]


if __name__ == "__main__":
    key = jax.random.PRNGKey(0)
    k_params, k_state, k_state2 = jax.random.split(key, 3)

    state_size = 16
    action_size = 4

    # ---- exact f32 path (tight tolerance) ----------------------------------
    params_f32 = init_qnetwork_params(k_params, state_size, action_size,
                                      weight_dtype=jnp.float32)
    batch = 8
    state = jax.random.normal(k_state, (batch, state_size), jnp.float32)
    q_values = qnetwork_forward(state, params_f32, action_size=action_size)
    jax.block_until_ready(q_values)
    q_ref = qnetwork_reference(state, params_f32, action_size)
    assert q_values.shape == (batch, action_size)
    assert jnp.allclose(q_values, q_ref, atol=1e-5, rtol=1e-5)

    # ---- default bf16 matmul path, non-divisible batch, multi-block grid ---
    params_bf16 = init_qnetwork_params(k_params, state_size, action_size)
    batch2 = 33
    state2 = jax.random.normal(k_state2, (batch2, state_size), jnp.float32)
    q2 = qnetwork_forward(state2, params_bf16, action_size=action_size,
                          block_m=16)
    jax.block_until_ready(q2)
    q2_ref = qnetwork_reference(state2, params_bf16, action_size)
    assert q2.shape == (batch2, action_size)
    assert jnp.allclose(q2, q2_ref, atol=1e-2, rtol=1e-2)

    # ---- bf16 output (halved writeback) on the same bf16 params ------------
    q3 = qnetwork_forward(state2, params_bf16, action_size=action_size,
                          block_m=16, out_dtype=jnp.bfloat16)
    jax.block_until_ready(q3)
    assert q3.dtype == jnp.bfloat16 and q3.shape == (batch2, action_size)
    assert jnp.allclose(q3.astype(jnp.float32), q2_ref, atol=3e-2, rtol=3e-2)

    print("KERNEL_OK")
</pallas_src>

<mosaic_0001>
module attributes {stable_mosaic.version = 11 : i64} {
  func.func @_qnet_kernel(%arg0: i32, %arg1: memref<8x16xf32, #tpu.memory_space<vmem>>, %arg2: memref<16x128xf32, #tpu.memory_space<vmem>>, %arg3: memref<1x128xf32, #tpu.memory_space<vmem>>, %arg4: memref<128x128xf32, #tpu.memory_space<vmem>>, %arg5: memref<1x128xf32, #tpu.memory_space<vmem>>, %arg6: memref<128x128xf32, #tpu.memory_space<vmem>>, %arg7: memref<1x128xf32, #tpu.memory_space<vmem>>, %arg8: memref<8x128xf32, #tpu.memory_space<vmem>>) attributes {dimension_semantics = [#tpu.dimension_semantics<parallel>], iteration_bounds = array<i64: 1>, scalar_prefetch = 0 : i64, scratch_operands = 0 : i64, tpu.core_type = #tpu.core_type<tc>, window_params = [{transform_indices = @transform_0, window_bounds = array<i64: 8, 16>}, {pipeline_mode = #tpu.pipeline_mode<synchronous>, transform_indices = @transform_1, window_bounds = array<i64: 16, 128>}, {pipeline_mode = #tpu.pipeline_mode<synchronous>, transform_indices = @transform_2, window_bounds = array<i64: 1, 128>}, {pipeline_mode = #tpu.pipeline_mode<synchronous>, transform_indices = @transform_3, window_bounds = array<i64: 128, 128>}, {pipeline_mode = #tpu.pipeline_mode<synchronous>, transform_indices = @transform_4, window_bounds = array<i64: 1, 128>}, {pipeline_mode = #tpu.pipeline_mode<synchronous>, transform_indices = @transform_5, window_bounds = array<i64: 128, 128>}, {pipeline_mode = #tpu.pipeline_mode<synchronous>, transform_indices = @transform_6, window_bounds = array<i64: 1, 128>}, {transform_indices = @transform_7, window_bounds = array<i64: 8, 128>}]} {
    %c0 = arith.constant 0 : index
    %c0_0 = arith.constant 0 : index
    %0 = vector.load %arg1[%c0, %c0_0] : memref<8x16xf32, #tpu.memory_space<vmem>>, vector<8x16xf32>
    %c0_1 = arith.constant 0 : index
    %c0_2 = arith.constant 0 : index
    %1 = vector.load %arg2[%c0_1, %c0_2] : memref<16x128xf32, #tpu.memory_space<vmem>>, vector<16x128xf32>
    %cst = arith.constant dense<0.000000e+00> : vector<8x128xf32>
    %2 = tpu.matmul %0, %1, %cst {dimension_numbers = #tpu.dot_dimension_numbers<[1], [0], [0], [1], [0, 0, 1, 1], [], []>} : vector<8x16xf32>, vector<16x128xf32>, vector<8x128xf32> -> vector<8x128xf32>
    %c0_3 = arith.constant 0 : index
    %c0_4 = arith.constant 0 : index
    %3 = vector.load %arg3[%c0_3, %c0_4] : memref<1x128xf32, #tpu.memory_space<vmem>>, vector<1x128xf32>
    %4 = vector.broadcast %3 : vector<1x128xf32> to vector<8x128xf32>
    %5 = arith.addf %2, %4 : vector<8x128xf32>
    %cst_5 = arith.constant 0.000000e+00 : f32
    %6 = vector.broadcast %cst_5 : f32 to vector<8x128xf32>
    %7 = arith.maximumf %5, %6 : vector<8x128xf32>
    %c0_6 = arith.constant 0 : index
    %c0_7 = arith.constant 0 : index
    %8 = vector.load %arg4[%c0_6, %c0_7] : memref<128x128xf32, #tpu.memory_space<vmem>>, vector<128x128xf32>
    %cst_8 = arith.constant dense<0.000000e+00> : vector<8x128xf32>
    %9 = tpu.matmul %7, %8, %cst_8 {dimension_numbers = #tpu.dot_dimension_numbers<[1], [0], [0], [1], [0, 0, 1, 1], [], []>} : vector<8x128xf32>, vector<128x128xf32>, vector<8x128xf32> -> vector<8x128xf32>
    %c0_9 = arith.constant 0 : index
    %c0_10 = arith.constant 0 : index
    %10 = vector.load %arg5[%c0_9, %c0_10] : memref<1x128xf32, #tpu.memory_space<vmem>>, vector<1x128xf32>
    %11 = vector.broadcast %10 : vector<1x128xf32> to vector<8x128xf32>
    %12 = arith.addf %9, %11 : vector<8x128xf32>
    %cst_11 = arith.constant 0.000000e+00 : f32
    %13 = vector.broadcast %cst_11 : f32 to vector<8x128xf32>
    %14 = arith.maximumf %12, %13 : vector<8x128xf32>
    %c0_12 = arith.constant 0 : index
    %c0_13 = arith.constant 0 : index
    %15 = vector.load %arg6[%c0_12, %c0_13] : memref<128x128xf32, #tpu.memory_space<vmem>>, vector<128x128xf32>
    %cst_14 = arith.constant dense<0.000000e+00> : vector<8x128xf32>
    %16 = tpu.matmul %14, %15, %cst_14 {dimension_numbers = #tpu.dot_dimension_numbers<[1], [0], [0], [1], [0, 0, 1, 1], [], []>} : vector<8x128xf32>, vector<128x128xf32>, vector<8x128xf32> -> vector<8x128xf32>
    %c0_15 = arith.constant 0 : index
    %c0_16 = arith.constant 0 : index
    %17 = vector.load %arg7[%c0_15, %c0_16] : memref<1x128xf32, #tpu.memory_space<vmem>>, vector<1x128xf32>
    %18 = vector.broadcast %17 : vector<1x128xf32> to vector<8x128xf32>
    %19 = arith.addf %16, %18 : vector<8x128xf32>
    %c0_17 = arith.constant 0 : index
    %c0_18 = arith.constant 0 : index
    %20 = vector.load %arg8[%c0_17, %c0_18] : memref<8x128xf32, #tpu.memory_space<vmem>>, vector<8x128xf32>
    tpu.vector_store %arg8[%c0_17, %c0_18], %19 {strides = array<i32>} : memref<8x128xf32, #tpu.memory_space<vmem>>, vector<8x128xf32>,
    return
  }
  func.func @transform_0(%arg0: i32) -> (i32, i32) {
    %c0_i32 = arith.constant 0 : i32
    %c0_i32_0 = arith.constant 0 : i32
    return %arg0, %c0_i32 : i32, i32
  }
  func.func @transform_1(%arg0: i32) -> (i32, i32) {
    %c0_i32 = arith.constant 0 : i32
    %c0_i32_0 = arith.constant 0 : i32
    %c0_i32_1 = arith.constant 0 : i32
    return %c0_i32, %c0_i32_0 : i32, i32
  }
  func.func @transform_2(%arg0: i32) -> (i32, i32) {
    %c0_i32 = arith.constant 0 : i32
    %c0_i32_0 = arith.constant 0 : i32
    %c0_i32_1 = arith.constant 0 : i32
    return %c0_i32, %c0_i32_0 : i32, i32
  }
  func.func @transform_3(%arg0: i32) -> (i32, i32) {
    %c0_i32 = arith.constant 0 : i32
    %c0_i32_0 = arith.constant 0 : i32
    %c0_i32_1 = arith.constant 0 : i32
    return %c0_i32, %c0_i32_0 : i32, i32
  }
  func.func @transform_4(%arg0: i32) -> (i32, i32) {
    %c0_i32 = arith.constant 0 : i32
    %c0_i32_0 = arith.constant 0 : i32
    %c0_i32_1 = arith.constant 0 : i32
    return %c0_i32, %c0_i32_0 : i32, i32
  }
  func.func @transform_5(%arg0: i32) -> (i32, i32) {
    %c0_i32 = arith.constant 0 : i32
    %c0_i32_0 = arith.constant 0 : i32
    %c0_i32_1 = arith.constant 0 : i32
    return %c0_i32, %c0_i32_0 : i32, i32
  }
  func.func @transform_6(%arg0: i32) -> (i32, i32) {
    %c0_i32 = arith.constant 0 : i32
    %c0_i32_0 = arith.constant 0 : i32
    %c0_i32_1 = arith.constant 0 : i32
    return %c0_i32, %c0_i32_0 : i32, i32
  }
  func.func @transform_7(%arg0: i32) -> (i32, i32) {
    %c0_i32 = arith.constant 0 : i32
    %c0_i32_0 = arith.constant 0 : i32
    return %arg0, %c0_i32 : i32, i32
  }
}

</mosaic_0001>

<bundles_post_ra>
// kernel: qnetwork_forward.1
= control target key start
LH: loop header
LB: loop body
LE: loop exit
PB: predicated region body
PF: predicated region fallthrough
CT: control target
= control target key end

     0   :  { %12 = vsyncpa [#allocation3], 0  ;;  %s769_s0 = inlined_call_operand.hbm [shape: f32[8,16], index: 0, kind: input, shape index: {}]   ;;  %s770_s1 = inlined_call_operand.hbm [shape: f32[16,128], index: 1, kind: input, shape index: {}]   ;;  %s771_s2 = inlined_call_operand.vmem [shape: f32[1,128], index: 2, kind: input, shape index: {}]   ;;  %s772_s3 = inlined_call_operand.hbm [shape: f32[128,128], index: 3, kind: input, shape index: {}]   ;;  %s773_s4 = inlined_call_operand.vmem [shape: f32[1,128], index: 4, kind: input, shape index: {}]   ;;  %s774_s5 = inlined_call_operand.hbm [shape: f32[128,128], index: 5, kind: input, shape index: {}]   ;;  %s775_s6 = inlined_call_operand.vmem [shape: f32[1,128], index: 6, kind: input, shape index: {}]   ;;  %s776_s7 = inlined_call_operand.vmem [shape: f32[8,128], index: 7, kind: output, shape index: {}]  }
   0x1   :  { %13 = vsyncpa [#allocation5], 0 }
   0x2   :  { %14 = vsyncpa [#allocation8], 0  ;;  %s631_s24 = smov [#allocation4]   ;;  %s537_s28 = scalar_lea.hbm %s770_s1, 256 }
   0x3   :  { %s30_s25 = sshll.u32 %s631_s24, 4  ;;  %p538_p0 = scmp.ne.s32.totalorder %s770_s1, %s537_s28  ;;  %s31_s25 = int_to_ptr.vmem [resolvable:$true] %s30_s25 }
   0x4   :  { %p541_p1 = scmp.lt.u32.totalorder %s537_s28, %s770_s1 }
   0x6   :  { %p543_p2 = pnand %p541_p1, %p538_p0 }
   0x8   :  { %546 = shalt.err (!%p543_p2)
}
   0x9   :  { %s547_s10 = scalar_lea.vmem %s31_s25, 256  ;;  %p552_p4 = scmp.lt.s32.totalorder %s31_s25, %s31_s25 }
   0xa   :  { %p548_p3 = scmp.ne.s32.totalorder %s31_s25, %s547_s10  ;;  %p553_p5 = scmp.lt.s32.totalorder %s547_s10, %s547_s10 }
   0xc   :  { %p554_p6 = por %p553_p5, %p552_p4 }
   0xe   :  { %p555_p7 = pnand %p554_p6, %p548_p3 }
  0x10   :  { %558 = shalt.err (!%p555_p7)
}
  0x11   :  { %s632_s11 = smov 128   ;;  %s633_s12 = smov 8  }
  0x12   :  { %36 = dma.hbm_to_vmem [thread:$0]  %s770_s1, 256, %s31_s25, [#allocation5], %s632_s11, %s632_s11, %s633_s12  }
  0x13   :  { %s634_s15 = smov [#allocation2]   ;;  %s635_s17 = smov [#allocation6]  }
  0x14   :  { %s21_s16 = sshll.u32 %s634_s15, 4  ;;  %s44_s18 = sshll.u32 %s635_s17, 4  ;;  %s22_s16 = int_to_ptr.vmem [resolvable:$true] %s21_s16  ;;  %s45_s18 = int_to_ptr.vmem [resolvable:$true] %s44_s18 }
  0x15   :  { %s559_s21 = scalar_lea.hbm %s769_s0, 128 }
  0x16   :  { %p560_p8 = scmp.ne.s32.totalorder %s769_s0, %s559_s21  ;;  %p563_p9 = scmp.lt.u32.totalorder %s559_s21, %s769_s0 }
  0x18   :  { %p565_p10 = pnand %p563_p9, %p560_p8 }
  0x1a   :  { %568 = shalt.err (!%p565_p10)
}
  0x1b   :  { %s569_s1 = scalar_lea.vmem %s22_s16, 128  ;;  %p574_p12 = scmp.lt.s32.totalorder %s22_s16, %s22_s16 }
  0x1c   :  { %p570_p11 = scmp.ne.s32.totalorder %s22_s16, %s569_s1  ;;  %p575_p13 = scmp.lt.s32.totalorder %s569_s1, %s569_s1 }
  0x1e   :  { %p576_p0 = por %p575_p13, %p574_p12 }
  0x20   :  { %p577_p1 = pnand %p576_p0, %p570_p11 }
  0x22   :  { %580 = shalt.err (!%p577_p1)
}
  0x23   :  { %24 = dma.hbm_to_vmem [thread:$0]  %s769_s0, 128, %s22_s16, [#allocation3]  }
  0x24   :  { %s581_s30 = scalar_lea.hbm %s772_s3, 2048 }
  0x25   :  { %p582_p2 = scmp.ne.s32.totalorder %s772_s3, %s581_s30  ;;  %p585_p3 = scmp.lt.u32.totalorder %s581_s30, %s772_s3 }
  0x27   :  { %p587_p4 = pnand %p585_p3, %p582_p2 }
  0x29   :  { %590 = shalt.err (!%p587_p4)
}
  0x2a   :  { %s591_s14 = scalar_lea.vmem %s45_s18, 2048  ;;  %p596_p6 = scmp.lt.s32.totalorder %s45_s18, %s45_s18 }
  0x2b   :  { %p592_p5 = scmp.ne.s32.totalorder %s45_s18, %s591_s14  ;;  %p597_p7 = scmp.lt.s32.totalorder %s591_s14, %s591_s14 }
  0x2d   :  { %p598_p8 = por %p597_p7, %p596_p6 }
  0x2f   :  { %p599_p9 = pnand %p598_p8, %p592_p5 }
  0x31   :  { %602 = shalt.err (!%p599_p9)
}
  0x32   :  { %50 = dma.hbm_to_vmem [thread:$0]  %s772_s3, 2048, %s45_s18, [#allocation5], %s632_s11, %s632_s11, %s633_s12  }
  0x33   :  { %s636_s16 = smov [#allocation7]   ;;  %s603_s21 = scalar_lea.hbm %s774_s5, 2048 }
  0x34   :  { %s58_s17 = sshll.u32 %s636_s16, 4  ;;  %p604_p10 = scmp.ne.s32.totalorder %s774_s5, %s603_s21  ;;  %s59_s17 = int_to_ptr.vmem [resolvable:$true] %s58_s17 }
  0x35   :  { %p607_p11 = scmp.lt.u32.totalorder %s603_s21, %s774_s5 }
  0x37   :  { %p609_p12 = pnand %p607_p11, %p604_p10 }
  0x39   :  { %612 = shalt.err (!%p609_p12)
}
  0x3a   :  { %s613_s1 = scalar_lea.vmem %s59_s17, 2048  ;;  %p618_p0 = scmp.lt.s32.totalorder %s59_s17, %s59_s17 }
  0x3b   :  { %p614_p13 = scmp.ne.s32.totalorder %s59_s17, %s613_s1  ;;  %p619_p1 = scmp.lt.s32.totalorder %s613_s1, %s613_s1 }
  0x3d   :  { %p620_p2 = por %p619_p1, %p618_p0 }
  0x3f   :  { %p621_p3 = pnand %p620_p2, %p614_p13 }
  0x41   :  { %624 = shalt.err (!%p621_p3)
}
  0x42   :  { %64 = dma.hbm_to_vmem [thread:$0]  %s774_s5, 2048, %s59_s17, [#allocation8], %s632_s11, %s632_s11, %s633_s12  }
  0x43   :  { %625 = dma.done.wait [#allocation3], 128  }
  0x44   :  { %626 = vsyncadd [#allocation3], 4294967168 }
  0x45   :  { %627 = dma.done.wait [#allocation5], 2304  }
  0x46   :  { %628 = vsyncadd [#allocation5], 4294964992 }
  0x47   :  { %629 = dma.done.wait [#allocation8], 2048  }
  0x48   :  { %630 = vsyncadd [#allocation8], 4294965248  ;;  %v637_v0 = vmov 0.0|0.0   ;;  %vm638_vm0 = vmmov 0   ;;  %v639_v1 = vmov 0.0   ;;  %v80_v2 = vld [vmem:[#allocation4] sm:$0xff] }
  0x49   :  { %477 = vmatprep.subr.bf16.mxu0 %v637_v0  ;;  %404 = vmatprep.mubr.msk.f32.mxu0 %vm638_vm0, %v639_v1  ;;  %v81_v3 = vld [vmem:[#allocation4 + $0x8] sm:$0xff]  ;;  %v164_v5 = vld [vmem:[#allocation6] sm:$0xff]  ;;  %v165_v6 = vld [vmem:[#allocation6 + $0x8] sm:$0xff]  ;;  %vm89_vm1 = vcmask 130048  }
  0x4a   :  { %480 = vmatprep.subr.bf16.mxu1 %v637_v0  ;;  %439 = vmatprep.mubr.msk.f32.mxu1 %vm638_vm0, %v639_v1  ;;  %v478_v4 = vpack.c.bf16 %v81_v3, %v80_v2  ;;  %v166_v7 = vld [vmem:[#allocation6 + $0x10] sm:$0xff]  ;;  %v481_v8 = vpack.c.bf16 %v165_v6, %v164_v5  ;;  %v167_v9 = vld [vmem:[#allocation6 + $0x18] sm:$0xff]  ;;  %v79_v10 = vld [vmem:[#allocation2] sm:$0xff] }
  0x4b   :  { %v484_v11 = vpack.c.bf16 %v167_v9, %v166_v7  ;;  %v168_v12 = vld [vmem:[#allocation6 + $0x20] sm:$0xff]  ;;  %v169_v13 = vld [vmem:[#allocation6 + $0x28] sm:$0xff]  ;;  %v170_v15 = vld [vmem:[#allocation6 + $0x30] sm:$0xff] }
  0x4c   :  { %479 = vmatpush3.bf16.msra.mxu0 %v478_v4  ;;  %482 = vmatpush3.bf16.msra.mxu1 %v481_v8  ;;  %v487_v14 = vpack.c.bf16 %v169_v13, %v168_v12  ;;  %v171_v16 = vld [vmem:[#allocation6 + $0x38] sm:$0xff]  ;;  %v172_v18 = vld [vmem:[#allocation6 + $0x40] sm:$0xff]  ;;  %v173_v19 = vld [vmem:[#allocation6 + $0x48] sm:$0xff] }
  0x4d   :  { %504 = vmatprep.subr.bf16.mxu0 %v637_v0  ;;  %483 = vmatprep.subr.bf16.mxu1 %v637_v0  ;;  %v490_v17 = vpack.c.bf16 %v171_v16, %v170_v15  ;;  %v493_v20 = vpack.c.bf16 %v173_v19, %v172_v18  ;;  %v174_v21 = vld [vmem:[#allocation6 + $0x50] sm:$0xff]  ;;  %v175_v22 = vld [vmem:[#allocation6 + $0x58] sm:$0xff]  ;;  %v176_v24 = vld [vmem:[#allocation6 + $0x60] sm:$0xff] }
  0x4e   :  { %v496_v23 = vpack.c.bf16 %v175_v22, %v174_v21  ;;  %v177_v25 = vld [vmem:[#allocation6 + $0x68] sm:$0xff]  ;;  %v178_v27 = vld [vmem:[#allocation6 + $0x70] sm:$0xff]  ;;  %v179_v28 = vld [vmem:[#allocation6 + $0x78] sm:$0xff] }
  0x4f   :  { %405 = vmatmul.mubr.msk.f32.vlgmr.msra.gmra.mrb[0].mxu0 %vm89_vm1, %v79_v10  ;;  %v499_v26 = vpack.c.bf16 %v177_v25, %v176_v24  ;;  %v502_v29 = vpack.c.bf16 %v179_v28, %v178_v27  ;;  %v258_v30 = vld [vmem:[#allocation7] sm:$0xff]  ;;  %v259_v31 = vld [vmem:[#allocation7 + $0x8] sm:$0xff]  ;;  %v260_v32 = vld [vmem:[#allocation7 + $0x10] sm:$0xff] }
  0x50   :  { %474 = vmatprep.mubr.msk.f32.mxu0 %vm638_vm0, %v639_v1  ;;  %485 = vmatpush3.bf16.msra.mxu1 %v484_v11  ;;  %v505_v33 = vpack.c.bf16 %v259_v31, %v258_v30  ;;  %v261_v34 = vld [vmem:[#allocation7 + $0x18] sm:$0xff]  ;;  %v262_v36 = vld [vmem:[#allocation7 + $0x20] sm:$0xff]  ;;  %v263_v37 = vld [vmem:[#allocation7 + $0x28] sm:$0xff] }
  0x51   :  { %486 = vmatprep.subr.bf16.mxu1 %v637_v0  ;;  %v508_v35 = vpack.c.bf16 %v261_v34, %v260_v32  ;;  %v511_v38 = vpack.c.bf16 %v263_v37, %v262_v36  ;;  %v264_v39 = vld [vmem:[#allocation7 + $0x30] sm:$0xff]  ;;  %v265_v40 = vld [vmem:[#allocation7 + $0x38] sm:$0xff]  ;;  %v266_v42 = vld [vmem:[#allocation7 + $0x40] sm:$0xff] }
  0x52   :  { %506 = vmatpush3.bf16.msra.mxu0 %v505_v33  ;;  %v514_v41 = vpack.c.bf16 %v265_v40, %v264_v39  ;;  %v267_v43 = vld [vmem:[#allocation7 + $0x48] sm:$0xff]  ;;  %v268_v45 = vld [vmem:[#allocation7 + $0x50] sm:$0xff]  ;;  %v269_v46 = vld [vmem:[#allocation7 + $0x58] sm:$0xff] }
  0x53   :  { %507 = vmatprep.subr.bf16.mxu0 %v637_v0  ;;  %v517_v44 = vpack.c.bf16 %v267_v43, %v266_v42  ;;  %v520_v47 = vpack.c.bf16 %v269_v46, %v268_v45  ;;  %v270_v48 = vld [vmem:[#allocation7 + $0x60] sm:$0xff]  ;;  %v271_v49 = vld [vmem:[#allocation7 + $0x68] sm:$0xff]  ;;  %v272_v56 = vld [vmem:[#allocation7 + $0x70] sm:$0xff] }
  0x54   :  { %488 = vmatpush3.bf16.msra.mxu1 %v487_v14  ;;  %v523_v50 = vpack.c.bf16 %v271_v49, %v270_v48  ;;  %v359_v51 = vld [vmem:[%s771_s2] ss:$0 sm:$0xff]  ;;  %v273_v57 = vld [vmem:[#allocation7 + $0x78] sm:$0xff] }
  0x55   :  { %489 = vmatprep.subr.bf16.mxu1 %v637_v0  ;;  %v526_v58 = vpack.c.bf16 %v273_v57, %v272_v56  ;;  %v361_v59 = vld [vmem:[%s773_s4] ss:$0 sm:$0xff] }
  0x56   :  { %509 = vmatpush3.bf16.msra.mxu0 %v508_v35 }
  0x57   :  { %510 = vmatprep.subr.bf16.mxu0 %v637_v0 }
  0x58   :  { %491 = vmatpush3.bf16.msra.mxu1 %v490_v17 }
  0x59   :  { %492 = vmatprep.subr.bf16.mxu1 %v637_v0 }
  0x5a   :  { %512 = vmatpush3.bf16.msra.mxu0 %v511_v38 }
  0x5b   :  { %513 = vmatprep.subr.bf16.mxu0 %v637_v0 }
  0x5c   :  { %494 = vmatpush3.bf16.msra.mxu1 %v493_v20 }
  0x5d   :  { %495 = vmatprep.subr.bf16.mxu1 %v637_v0 }
  0x5e   :  { %515 = vmatpush3.bf16.msra.mxu0 %v514_v41 }
  0x5f   :  { %516 = vmatprep.subr.bf16.mxu0 %v637_v0 }
  0x60   :  { %497 = vmatpush3.bf16.msra.mxu1 %v496_v23 }
  0x61   :  { %498 = vmatprep.subr.bf16.mxu1 %v637_v0 }
  0x62   :  { %518 = vmatpush3.bf16.msra.mxu0 %v517_v44 }
  0x63   :  { %519 = vmatprep.subr.bf16.mxu0 %v637_v0 }
  0x64   :  { %500 = vmatpush3.bf16.msra.mxu1 %v499_v26 }
  0x65   :  { %501 = vmatprep.subr.bf16.mxu1 %v637_v0 }
  0x66   :  { %521 = vmatpush3.bf16.msra.mxu0 %v520_v47 }
  0x67   :  { %522 = vmatprep.subr.bf16.mxu0 %v637_v0 }
  0x68   :  { %503 = vmatpush3.bf16.msra.mxu1 %v502_v29 }
  0x6a   :  { %524 = vmatpush3.bf16.msra.mxu0 %v523_v50 }
  0x6b   :  { %525 = vmatprep.subr.bf16.mxu0 %v637_v0  ;;  %v362_v0 = vld [vmem:[%s775_s6] ss:$0 sm:$0xff] }
  0x6e   :  { %527 = vmatpush3.bf16.msra.mxu0 %v526_v58 }
 0x122   :  { %v159_v52 = vpop.f32.mrb[0].mxu0 }
 0x123   :  { %v160_v53 = vadd.f32 %v359_v51, %v159_v52  ;;  %v406_v54 = vpop.f32.mrb[1].mxu0 }
 0x125   :  { %v163_v55 = vmax.f32 %v160_v53, 0.0 }
 0x127   :  { %440 = vmatmul.mubr.f32.vlgmr.msra.gmra.mrb[0].mxu1 %v163_v55 }
 0x1fa   :  { %v253_v60 = vpop.f32.mrb[0].mxu1 }
 0x1fb   :  { %v254_v61 = vadd.f32 %v361_v59, %v253_v60  ;;  %v441_v62 = vpop.f32.mrb[1].mxu1 }
 0x1fd   :  { %v257_v63 = vmax.f32 %v254_v61, 0.0 }
 0x1ff   :  { %475 = vmatmul.mubr.f32.vlgmr.msra.gmra.mrb[2].mxu0 %v257_v63 }
 0x2d2   :  { %v347_v1 = vpop.f32.mrb[2].mxu0 }
 0x2d3   :  { %v348_v2 = vadd.f32 %v362_v0, %v347_v1  ;;  %v476_v3 = vpop.f32.mrb[3].mxu0 }
 0x2d5   :  { %351 = vst [vmem:[%s776_s7] sm:$0xff] %v348_v2 }
 0x2d6   :  { %356 = vsyncpa [#allocation3], 1 }
 0x2d7   :  { %357 = vsyncpa [#allocation5], 1 }
 0x2d8   :  { %358 = vsyncpa [#allocation8], 1 }

</bundles_post_ra>
